<compile_context>
chip_gen: v7x
topology: tpu7x:2x2x1
jax: 0.10.0
libtpu: 0.0.40
codegen_flags: <defaults>
</compile_context>

<pallas_src>
import functools

import jax
import jax.numpy as jnp
from jax.experimental import pallas as pl
from jax.experimental.pallas import tpu as pltpu

_LANE = 128


def _round_up(n, m):
    return (n + m - 1) // m * m


def _pick_batch_tile(B):
    # Memory-bound kernel: prefer big tiles (>=512 rows ~ 85% of HBM roofline),
    # but keep at least two grid steps for mid-size batches so the "parallel"
    # batch axis actually shards across v7x's two TensorCores.
    if B <= 16:
        return B                               # tiny/demo: single exact tile
    return min(_round_up(pl.cdiv(B, 2), 8), 512)


# ---------------------------------------------------------------------------
# Kernel: whole Encoder forward for one batch tile, fully VMEM-resident.
# ---------------------------------------------------------------------------
def _encoder_kernel(*refs, mode, inv_temperature, S, Z):
    if mode:
        (x_ref, ws_ref, bs_ref, wzx_ref, wzs_ref, bz_ref, out_ref) = refs
        g_ref = None
    else:
        (x_ref, g_ref, ws_ref, bs_ref, wzx_ref, wzs_ref, bz_ref, out_ref) = refs

    x = x_ref[...]                                              # (TB, D)

    # ----- s_logits = encoder_s(x) ------------------------------------------
    s_logits = (jnp.dot(x, ws_ref[...], preferred_element_type=jnp.float32)
                + bs_ref[...])                                  # (TB, S) f32

    # ----- s_samples ---------------------------------------------------------
    if mode:
        # one_hot(argmax(s_logits)) with first-max tie-breaking, built from
        # lane reductions only (Mosaic-friendly, no jnp.argmax).
        cols = jax.lax.broadcasted_iota(jnp.int32, s_logits.shape, 1)
        row_max = jnp.max(s_logits, axis=-1, keepdims=True)
        first = jnp.min(jnp.where(s_logits >= row_max, cols, jnp.int32(2 ** 30)),
                        axis=-1, keepdims=True)
        s_samples = (cols == first).astype(jnp.float32)
    else:
        # Gumbel-softmax relaxed sample; Gumbel noise g = -log(-log(U)) is
        # supplied by the wrapper (no in-kernel PRNG needed).
        y = (s_logits + g_ref[...]) * inv_temperature
        y = y - jnp.max(y, axis=-1, keepdims=True)
        e = jnp.exp(y)
        s_samples = e / jnp.sum(e, axis=-1, keepdims=True)

    # ----- fused z head: concat(x, s) @ [W_loc | W_log_scale] + [b_loc|b_ls] -
    z = (jnp.dot(x, wzx_ref[...], preferred_element_type=jnp.float32)
         + jnp.dot(s_samples.astype(wzs_ref.dtype), wzs_ref[...],
                   preferred_element_type=jnp.float32)
         + bz_ref[...])                                         # (TB, 2Z) f32

    # ----- single tightly-packed lane-dense output ---------------------------
    # One 128-lane segment; padding lanes [2S+2Z, out_w) are deliberately left
    # uninitialized (stale VMEM) and are never read by the wrapper.  No memset.
    out_ref[:, 0:S] = s_samples
    out_ref[:, S:2 * S] = s_logits
    out_ref[:, 2 * S:2 * S + 2 * Z] = z


# ---------------------------------------------------------------------------
# One-time parameter preparation (hoisted out of the per-call wrapper).
# dtype=jnp.bfloat16 gives the bf16-matmul-input path for large D on v5e/v6e
# (accumulation stays f32 via preferred_element_type); v7x note: do NOT reuse
# an int8/int4 quantized variant there — v7x MXU has fp8, not int.
# ---------------------------------------------------------------------------
def prepare_params(params, input_size, *, dtype=jnp.float32):
    D = input_size
    S = params["w_s"].shape[1]
    Z = params["w_loc"].shape[1]
    w_z = jnp.concatenate([params["w_loc"], params["w_log_scale"]], axis=1)  # (D+S, 2Z)
    b_z = jnp.concatenate([params["b_loc"], params["b_log_scale"]]).reshape(1, 2 * Z)
    return {
        "D": D, "S": S, "Z": Z,
        "w_s": jnp.asarray(params["w_s"], dtype),
        "b_s": jnp.asarray(params["b_s"], jnp.float32).reshape(1, S),
        "w_z_x": w_z[:D].astype(dtype),            # (D, 2Z)
        "w_z_s": w_z[D:].astype(dtype),            # (S, 2Z)
        "b_z": b_z.astype(jnp.float32),            # (1, 2Z)
    }


# ---------------------------------------------------------------------------
# Python wrapper
# ---------------------------------------------------------------------------
def encoder_forward(prepped, x, key=None, *, mode=False, training=True,
                    temperature=1.0):
    """Pallas implementation of Encoder.forward.

    Returns (s_samples, [s_logits, z_loc, z_log_scale]).
    """
    D, S, Z = prepped["D"], prepped["S"], prepped["Z"]
    B = x.shape[0]
    assert x.shape[1] == D

    x = x.astype(prepped["w_s"].dtype)

    out_w = _round_up(2 * S + 2 * Z, _LANE)        # single 128-lane segment
    TB = _pick_batch_tile(B)
    grid = (pl.cdiv(B, TB),)
    # Note: when B is not a multiple of TB the last grid step computes on
    # padded garbage rows; the bounded output write discards them (benign).

    kernel = functools.partial(
        _encoder_kernel, mode=mode,
        inv_temperature=1.0 / float(temperature), S=S, Z=Z)

    full = lambda i: (0, 0)     # weights: grid-invariant (fetched once, reused)
    tile = lambda i: (i, 0)     # activations / outputs: tiled over batch

    in_specs = [pl.BlockSpec((TB, D), tile)]        # x
    args = [x]
    if not mode:
        # TODO(synk): eval-mode .sample() of GumbelDistribution is ambiguous in
        # the reference; both training and eval use the relaxed rsample path.
        del training
        g = jax.random.gumbel(key, (B, S), jnp.float32)
        in_specs.append(pl.BlockSpec((TB, S), tile))    # gumbel noise
        args.append(g)
    # Grid-invariant weights/biases.  (Single-buffering them via
    # pipeline_mode=pl.Buffered(1) would halve resident weight VMEM on v7x;
    # omitted here for portability — index_map invariance already avoids
    # re-issuing their DMAs across grid steps.)
    in_specs += [
        pl.BlockSpec((D, S), full),                 # w_s
        pl.BlockSpec((1, S), full),                 # b_s
        pl.BlockSpec((D, 2 * Z), full),             # w_z_x
        pl.BlockSpec((S, 2 * Z), full),             # w_z_s
        pl.BlockSpec((1, 2 * Z), full),             # b_z
    ]
    args += [prepped["w_s"], prepped["b_s"],
             prepped["w_z_x"], prepped["w_z_s"], prepped["b_z"]]

    packed = pl.pallas_call(
        kernel,
        grid=grid,
        out_shape=jax.ShapeDtypeStruct((B, out_w), jnp.float32),
        in_specs=in_specs,
        out_specs=pl.BlockSpec((TB, out_w), tile),
        compiler_params=pltpu.CompilerParams(
            dimension_semantics=("parallel",),
            vmem_limit_bytes=32 * 1024 * 1024),
    )(*args)

    s_samples = packed[:, 0:S]
    s_logits = packed[:, S:2 * S]
    z_loc = packed[:, 2 * S:2 * S + Z]
    z_log_scale = packed[:, 2 * S + Z:2 * S + 2 * Z]
    return s_samples, [s_logits, z_loc, z_log_scale]


# ---------------------------------------------------------------------------
# Deterministic parameter init (mirrors init_weights: normal std=0.05, bias .01)
# ---------------------------------------------------------------------------
def make_params(key, input_size, size_s, size_z):
    k1, k2, k3 = jax.random.split(key, 3)
    return {
        "w_s": 0.05 * jax.random.normal(k1, (input_size, size_s), jnp.float32),
        "b_s": jnp.full((size_s,), 0.01, jnp.float32),
        "w_loc": 0.05 * jax.random.normal(
            k2, (input_size + size_s, size_z), jnp.float32),
        "b_loc": jnp.full((size_z,), 0.01, jnp.float32),
        "w_log_scale": 0.05 * jax.random.normal(
            k3, (input_size + size_s, size_z), jnp.float32),
        "b_log_scale": jnp.full((size_z,), 0.01, jnp.float32),
    }


# ---------------------------------------------------------------------------
# Pure-JAX reference (mirrors the PyTorch module) for correctness checking.
# ---------------------------------------------------------------------------
def _encoder_reference(params, x, g, *, mode, temperature=1.0):
    hp = jax.lax.Precision.HIGHEST
    s_logits = jnp.dot(x, params["w_s"], precision=hp) + params["b_s"]
    if mode:
        s_samples = jax.nn.one_hot(jnp.argmax(s_logits, axis=-1),
                                   s_logits.shape[-1], dtype=jnp.float32)
    else:
        s_samples = jax.nn.softmax((s_logits + g) / temperature, axis=-1)
    h = jnp.concatenate([x, s_samples], axis=-1)
    z_loc = jnp.dot(h, params["w_loc"], precision=hp) + params["b_loc"]
    z_log_scale = (jnp.dot(h, params["w_log_scale"], precision=hp)
                   + params["b_log_scale"])
    return s_samples, s_logits, z_loc, z_log_scale


if __name__ == "__main__":
    # small shapes: batch=8, input_size (sum of prob_model sizes)=12,
    # size_s=4, size_z=6
    B, D, S, Z = 8, 12, 4, 6

    key = jax.random.PRNGKey(0)
    kx, kp, kg = jax.random.split(key, 3)
    x = jax.random.normal(kx, (B, D), jnp.float32)
    params = make_params(kp, D, S, Z)
    prepped = prepare_params(params, D)

    # ---- default path: mode=False (Gumbel-softmax relaxed sample) ----------
    s_samples, (s_logits, z_loc, z_log_scale) = encoder_forward(
        prepped, x, kg, mode=False, training=True)
    jax.block_until_ready((s_samples, s_logits, z_loc, z_log_scale))

    g_ref = jax.random.gumbel(kg, (B, S), jnp.float32)
    rs, rl, rzl, rzs = _encoder_reference(params, x, g_ref, mode=False)
    assert jnp.allclose(s_samples, rs, atol=5e-3), "s_samples mismatch"
    assert jnp.allclose(s_logits, rl, atol=5e-3), "s_logits mismatch"
    assert jnp.allclose(z_loc, rzl, atol=5e-3), "z_loc mismatch"
    assert jnp.allclose(z_log_scale, rzs, atol=5e-3), "z_log_scale mismatch"
    assert jnp.allclose(jnp.sum(s_samples, axis=-1), 1.0, atol=1e-5)

    # ---- mode=True path: deterministic one-hot argmax ----------------------
    s_hard, (s_logits_m, z_loc_m, z_log_scale_m) = encoder_forward(
        prepped, x, mode=True)
    jax.block_until_ready((s_hard, s_logits_m, z_loc_m, z_log_scale_m))

    rs_m, rl_m, rzl_m, rzs_m = _encoder_reference(params, x, g_ref, mode=True)
    assert jnp.allclose(s_hard, rs_m, atol=1e-6), "hard s_samples mismatch"
    assert jnp.allclose(s_logits_m, rl_m, atol=5e-3), "s_logits (mode) mismatch"
    assert jnp.allclose(z_loc_m, rzl_m, atol=5e-3), "z_loc (mode) mismatch"
    assert jnp.allclose(z_log_scale_m, rzs_m, atol=5e-3), "z_log_scale (mode) mismatch"
    assert jnp.allclose(jnp.sum(s_hard, axis=-1), 1.0)

    assert s_samples.shape == (B, S) and z_loc.shape == (B, Z)
    print("KERNEL_OK")
</pallas_src>

<mosaic_0001>
module attributes {stable_mosaic.version = 11 : i64} {
  func.func @_encoder_kernel(%arg0: i32, %arg1: memref<8x12xf32, #tpu.memory_space<vmem>>, %arg2: memref<8x4xf32, #tpu.memory_space<vmem>>, %arg3: memref<12x4xf32, #tpu.memory_space<vmem>>, %arg4: memref<1x4xf32, #tpu.memory_space<vmem>>, %arg5: memref<12x12xf32, #tpu.memory_space<vmem>>, %arg6: memref<4x12xf32, #tpu.memory_space<vmem>>, %arg7: memref<1x12xf32, #tpu.memory_space<vmem>>, %arg8: memref<8x128xf32, #tpu.memory_space<vmem>>) attributes {dimension_semantics = [#tpu.dimension_semantics<parallel>], iteration_bounds = array<i64: 1>, scalar_prefetch = 0 : i64, scratch_operands = 0 : i64, tpu.core_type = #tpu.core_type<tc>, window_params = [{transform_indices = @transform_0, window_bounds = array<i64: 8, 12>}, {transform_indices = @transform_1, window_bounds = array<i64: 8, 4>}, {pipeline_mode = #tpu.pipeline_mode<synchronous>, transform_indices = @transform_2, window_bounds = array<i64: 12, 4>}, {pipeline_mode = #tpu.pipeline_mode<synchronous>, transform_indices = @transform_3, window_bounds = array<i64: 1, 4>}, {pipeline_mode = #tpu.pipeline_mode<synchronous>, transform_indices = @transform_4, window_bounds = array<i64: 12, 12>}, {pipeline_mode = #tpu.pipeline_mode<synchronous>, transform_indices = @transform_5, window_bounds = array<i64: 4, 12>}, {pipeline_mode = #tpu.pipeline_mode<synchronous>, transform_indices = @transform_6, window_bounds = array<i64: 1, 12>}, {transform_indices = @transform_7, window_bounds = array<i64: 8, 128>}]} {
    %c0 = arith.constant 0 : index
    %c0_0 = arith.constant 0 : index
    %0 = vector.load %arg1[%c0, %c0_0] : memref<8x12xf32, #tpu.memory_space<vmem>>, vector<8x12xf32>
    %c0_1 = arith.constant 0 : index
    %c0_2 = arith.constant 0 : index
    %1 = vector.load %arg3[%c0_1, %c0_2] : memref<12x4xf32, #tpu.memory_space<vmem>>, vector<12x4xf32>
    %cst = arith.constant dense<0.000000e+00> : vector<8x4xf32>
    %2 = tpu.matmul %0, %1, %cst {dimension_numbers = #tpu.dot_dimension_numbers<[1], [0], [0], [1], [0, 0, 1, 1], [], []>} : vector<8x12xf32>, vector<12x4xf32>, vector<8x4xf32> -> vector<8x4xf32>
    %c0_3 = arith.constant 0 : index
    %c0_4 = arith.constant 0 : index
    %3 = vector.load %arg4[%c0_3, %c0_4] : memref<1x4xf32, #tpu.memory_space<vmem>>, vector<1x4xf32>
    %4 = vector.broadcast %3 : vector<1x4xf32> to vector<8x4xf32>
    %5 = arith.addf %2, %4 : vector<8x4xf32>
    %c0_5 = arith.constant 0 : index
    %c0_6 = arith.constant 0 : index
    %6 = vector.load %arg2[%c0_5, %c0_6] : memref<8x4xf32, #tpu.memory_space<vmem>>, vector<8x4xf32>
    %7 = arith.addf %5, %6 : vector<8x4xf32>
    %cst_7 = arith.constant 1.000000e+00 : f32
    %8 = vector.broadcast %cst_7 : f32 to vector<8x4xf32>
    %9 = arith.mulf %7, %8 : vector<8x4xf32>
    %cst_8 = arith.constant dense<0xFF800000> : vector<8xf32>
    %10 = vector.multi_reduction <maximumf>, %9, %cst_8 [1] : vector<8x4xf32> to vector<8xf32>
    %11 = vector.shape_cast %10 : vector<8xf32> to vector<8x1xf32>
    %12 = vector.broadcast %11 : vector<8x1xf32> to vector<8x4xf32>
    %13 = arith.subf %9, %12 : vector<8x4xf32>
    %14 = math.exp %13 : vector<8x4xf32>
    %cst_9 = arith.constant dense<0.000000e+00> : vector<8xf32>
    %15 = vector.multi_reduction <add>, %14, %cst_9 [1] : vector<8x4xf32> to vector<8xf32>
    %16 = vector.shape_cast %15 : vector<8xf32> to vector<8x1xf32>
    %17 = vector.broadcast %16 : vector<8x1xf32> to vector<8x4xf32>
    %18 = arith.divf %14, %17 : vector<8x4xf32>
    %c0_10 = arith.constant 0 : index
    %c0_11 = arith.constant 0 : index
    %19 = vector.load %arg5[%c0_10, %c0_11] : memref<12x12xf32, #tpu.memory_space<vmem>>, vector<12x12xf32>
    %cst_12 = arith.constant dense<0.000000e+00> : vector<8x12xf32>
    %20 = tpu.matmul %0, %19, %cst_12 {dimension_numbers = #tpu.dot_dimension_numbers<[1], [0], [0], [1], [0, 0, 1, 1], [], []>} : vector<8x12xf32>, vector<12x12xf32>, vector<8x12xf32> -> vector<8x12xf32>
    %c0_13 = arith.constant 0 : index
    %c0_14 = arith.constant 0 : index
    %21 = vector.load %arg6[%c0_13, %c0_14] : memref<4x12xf32, #tpu.memory_space<vmem>>, vector<4x12xf32>
    %cst_15 = arith.constant dense<0.000000e+00> : vector<8x12xf32>
    %22 = tpu.matmul %18, %21, %cst_15 {dimension_numbers = #tpu.dot_dimension_numbers<[1], [0], [0], [1], [0, 0, 1, 1], [], []>} : vector<8x4xf32>, vector<4x12xf32>, vector<8x12xf32> -> vector<8x12xf32>
    %23 = arith.addf %20, %22 : vector<8x12xf32>
    %c0_16 = arith.constant 0 : index
    %c0_17 = arith.constant 0 : index
    %24 = vector.load %arg7[%c0_16, %c0_17] : memref<1x12xf32, #tpu.memory_space<vmem>>, vector<1x12xf32>
    %25 = vector.broadcast %24 : vector<1x12xf32> to vector<8x12xf32>
    %26 = arith.addf %23, %25 : vector<8x12xf32>
    %c0_18 = arith.constant 0 : index
    %c0_19 = arith.constant 0 : index
    %27 = vector.load %arg8[%c0_18, %c0_19] : memref<8x128xf32, #tpu.memory_space<vmem>>, vector<8x4xf32>
    tpu.vector_store %arg8[%c0_18, %c0_19], %18 {strides = array<i32>} : memref<8x128xf32, #tpu.memory_space<vmem>>, vector<8x4xf32>,
    %c0_20 = arith.constant 0 : index
    %c4 = arith.constant 4 : index
    %28 = vector.load %arg8[%c0_20, %c4] : memref<8x128xf32, #tpu.memory_space<vmem>>, vector<8x4xf32>
    tpu.vector_store %arg8[%c0_20, %c4], %5 {strides = array<i32>} : memref<8x128xf32, #tpu.memory_space<vmem>>, vector<8x4xf32>,
    %c0_21 = arith.constant 0 : index
    %c8 = arith.constant 8 : index
    %29 = vector.load %arg8[%c0_21, %c8] : memref<8x128xf32, #tpu.memory_space<vmem>>, vector<8x12xf32>
    tpu.vector_store %arg8[%c0_21, %c8], %26 {strides = array<i32>} : memref<8x128xf32, #tpu.memory_space<vmem>>, vector<8x12xf32>,
    return
  }
  func.func @transform_0(%arg0: i32) -> (i32, i32) {
    %c0_i32 = arith.constant 0 : i32
    %c0_i32_0 = arith.constant 0 : i32
    return %arg0, %c0_i32 : i32, i32
  }
  func.func @transform_1(%arg0: i32) -> (i32, i32) {
    %c0_i32 = arith.constant 0 : i32
    %c0_i32_0 = arith.constant 0 : i32
    return %arg0, %c0_i32 : i32, i32
  }
  func.func @transform_2(%arg0: i32) -> (i32, i32) {
    %c0_i32 = arith.constant 0 : i32
    %c0_i32_0 = arith.constant 0 : i32
    %c0_i32_1 = arith.constant 0 : i32
    return %c0_i32, %c0_i32_0 : i32, i32
  }
  func.func @transform_3(%arg0: i32) -> (i32, i32) {
    %c0_i32 = arith.constant 0 : i32
    %c0_i32_0 = arith.constant 0 : i32
    %c0_i32_1 = arith.constant 0 : i32
    return %c0_i32, %c0_i32_0 : i32, i32
  }
  func.func @transform_4(%arg0: i32) -> (i32, i32) {
    %c0_i32 = arith.constant 0 : i32
    %c0_i32_0 = arith.constant 0 : i32
    %c0_i32_1 = arith.constant 0 : i32
    return %c0_i32, %c0_i32_0 : i32, i32
  }
  func.func @transform_5(%arg0: i32) -> (i32, i32) {
    %c0_i32 = arith.constant 0 : i32
    %c0_i32_0 = arith.constant 0 : i32
    %c0_i32_1 = arith.constant 0 : i32
    return %c0_i32, %c0_i32_0 : i32, i32
  }
  func.func @transform_6(%arg0: i32) -> (i32, i32) {
    %c0_i32 = arith.constant 0 : i32
    %c0_i32_0 = arith.constant 0 : i32
    %c0_i32_1 = arith.constant 0 : i32
    return %c0_i32, %c0_i32_0 : i32, i32
  }
  func.func @transform_7(%arg0: i32) -> (i32, i32) {
    %c0_i32 = arith.constant 0 : i32
    %c0_i32_0 = arith.constant 0 : i32
    return %arg0, %c0_i32 : i32, i32
  }
}

</mosaic_0001>

<bundles_post_ra>
// kernel: tpu_custom_call.1
= control target key start
LH: loop header
LB: loop body
LE: loop exit
PB: predicated region body
PF: predicated region fallthrough
CT: control target
= control target key end

     0   :  { %vm41_vm0 = vcmask 1043456   ;;  %v394_v2 = vmov 0.0|0.0   ;;  %vm395_vm1 = vmmov 1   ;;  %vm396_vm3 = vmmov 0   ;;  %s499_s0 = inlined_call_operand.vmem [shape: f32[8,12], index: 0, kind: input, shape index: {}]   ;;  %s500_s1 = inlined_call_operand.vmem [shape: f32[8,4], index: 1, kind: input, shape index: {}]   ;;  %s501_s2 = inlined_call_operand.vmem [shape: f32[12,4], index: 2, kind: input, shape index: {}]   ;;  %s502_s3 = inlined_call_operand.vmem [shape: f32[1,4], index: 3, kind: input, shape index: {}]   ;;  %s503_s4 = inlined_call_operand.vmem [shape: f32[12,12], index: 4, kind: input, shape index: {}]   ;;  %s504_s5 = inlined_call_operand.vmem [shape: f32[4,12], index: 5, kind: input, shape index: {}]   ;;  %s505_s6 = inlined_call_operand.vmem [shape: f32[1,12], index: 6, kind: input, shape index: {}]   ;;  %s506_s7 = inlined_call_operand.hbm [shape: f32[8,128], index: 7, kind: output, shape index: {}]  }
   0x1   :  { %v28_v0 = vld [vmem:[%s501_s2] sm:$0xff]  ;;  %v29_v1 = vld [vmem:[%s501_s2 + $0x8] sm:$0xf]  ;;  %351 = vmatprep.subr.bf16.mxu0 %v394_v2  ;;  %vm448_vm2 = vmpackc.low %vm41_vm0, %vm395_vm1  ;;  %v397_v5 = vmov 0.0  }
   0x2   :  { %v352_v3 = vpack.c.bf16 %v29_v1, %v28_v0  ;;  %336 = vmatprep.mubr.msk.f32.mxu0 %vm396_vm3, %v397_v5  ;;  %339 = vmatprep.subr.mxu1 %v397_v5 }
   0x3   :  { %12 = vsyncpa [#allocation3], 0  ;;  %v27_v6 = vld [vmem:[%s499_s0] sm:$0xff]  ;;  %vm37_vm4 = vcmask 97280   ;;  %341 = vmatprep.mubr.msk.f32.mxu1 %vm396_vm3, %v397_v5  ;;  %vm117_vm5 = vcmask 31744   ;;  %s398_s10 = smov 4  }
   0x4   :  { %354 = vmatpush3.bf16.msk.msra.mxu0 %vm448_vm2, %v352_v3  ;;  %v316_v7 = vld [vmem:[%s502_s3] ss:$0 sm:$0xff]  ;;  %v130_v22 = vld [vmem:[%s503_s4 + $0x8] sm:$0xf]  ;;  %vm294_vm6 = vcmask 64544   ;;  %s399_s14 = smov 8  }
   0x5   :  { %v115_v9 = vld [vmem:[%s500_s1] sm:$0xff]  ;;  %s400_s15 = smov [#allocation2]   ;;  %vm300_vm7 = vcmask 162880  }
   0x6   :  { %v131_v19 = vld [vmem:[%s504_s5] sm:$0xf]  ;;  %s308_s16 = sshll.u32 %s400_s15, 4  ;;  %s309_s16 = int_to_ptr.vmem [resolvable:$true] %s308_s16 }
   0x7   :  { %337 = vmatmul.mubr.msk.f32.vlgmr.msra.gmra.mrb[0].mxu0 %vm37_vm4, %v27_v6  ;;  %340 = vmatpush3.msk.msra.mxu1 %vm41_vm0, %v131_v19  ;;  %v129_v21 = vld [vmem:[%s503_s4] sm:$0xff]  ;;  %s370_s17 = scalar_lea.vmem %s309_s16, 128  ;;  %p375_p1 = scmp.lt.s32.totalorder %s309_s16, %s309_s16 }
   0x8   :  { %355 = vmatprep.subr.bf16.mxu1 %v394_v2  ;;  %v356_v24 = vpack.c.bf16 %v130_v22, %v129_v21  ;;  %v323_v30 = vld [vmem:[%s505_s6] ss:$0 sm:$0xff]  ;;  %p371_p0 = scmp.ne.s32.totalorder %s309_s16, %s370_s17  ;;  %p376_p2 = scmp.lt.s32.totalorder %s370_s17, %s370_s17 }
   0xa   :  { %p377_p3 = por %p376_p2, %p375_p1 }
   0xc   :  { %p378_p4 = pnand %p377_p3, %p371_p0 }
  0xda   :  { %v111_v8 = vpop.f32.mrb[0].mxu0 }
  0xdb   :  { %v112_v10 = vadd.f32 %v316_v7, %v111_v8  ;;  %v338_v11 = vpop.f32.mrb[1].mxu0 }
  0xdd   :  { %291 = vrot.lane.b32.xlu1 %v112_v10, %s398_s10  ;;  %v116_v12 = vadd.f32 %v115_v9, %v112_v10 }
  0xdf   :  { %v118_v13 = vsel %vm117_vm5, %v116_v12, -inf }
  0xe0   :  { %119 = vmax.xlane.f32.xlu0 %v118_v13 }
 0x14f   :  { %v292_v26 = vpop.permute.xlu1 %291 }
 0x16d   :  { %v120_v14 = vpop.xlane.xlu0 %119 }
 0x16e   :  { %v121_v15 = vsub.f32 %v116_v12, %v120_v14 }
 0x170   :  { %v122_v16 = vmul.f32 1.442695, %v121_v15 }
 0x172   :  { %366 = vpow2.f32 %v122_v16 }
 0x17c   :  { %v367_v17 = vpop.eup %366 }
 0x17d   :  { %v124_v18 = vsel %vm117_vm5, %v367_v17, 0.0 }
 0x17e   :  { %125 = vadd.xlane.f32.xlu0 %v124_v18 }
 0x20b   :  { %v126_v20 = vpop.xlane.xlu0 %125 }
 0x20c   :  { %368 = vrcp.f32 %v126_v20 }
 0x216   :  { %v369_v23 = vpop.eup %368 }
 0x217   :  { %v128_v25 = vmul.f32 %v369_v23, %v367_v17 }
 0x219   :  { %342 = vmatmul.mubr.msk.f32.vlgmr.msra.gmra.mrb[0].mxu1 %vm117_vm5, %v128_v25  ;;  %289 = vst.msk [vmem:[#allocation2] sm:$0xff] %vm117_vm5, %v128_v25 }
 0x21a   :  { %358 = vmatpush3.bf16.msk.msra.mxu1 %vm448_vm2, %v356_v24  ;;  %348 = vmatprep.mubr.msk.f32.mxu1 %vm396_vm3, %v397_v5  ;;  %295 = vst.msk [vmem:[#allocation2] sm:$0xff] %vm294_vm6, %v292_v26 }
 0x21d   :  { %349 = vmatmul.mubr.msk.f32.vlgmr.msra.gmra.mrb[2].mxu1 %vm37_vm4, %v27_v6 }
 0x2ec   :  { %v204_v27 = vpop.f32.mrb[0].mxu1 }
 0x2ed   :  { %v343_v28 = vpop.f32.mrb[1].mxu1 }
 0x2f0   :  { %v277_v29 = vpop.f32.mrb[2].mxu1 }
 0x2f1   :  { %v278_v31 = vadd.f32 %v277_v29, %v204_v27  ;;  %v350_v32 = vpop.f32.mrb[3].mxu1 }
 0x2f3   :  { %v288_v33 = vadd.f32 %v323_v30, %v278_v31 }
 0x2f5   :  { %297 = vrot.lane.b32.xlu1 %v288_v33, %s399_s14 }
 0x367   :  { %v298_v34 = vpop.permute.xlu1 %297 }
 0x368   :  { %301 = vst.msk [vmem:[#allocation2] sm:$0xff] %vm300_vm7, %v298_v34 }
 0x369   :  { %381 = shalt.err (!%p378_p4)
}
 0x36a   :  { %s382_s19 = scalar_lea.hbm %s506_s7, 128 }
 0x36b   :  { %p383_p5 = scmp.ne.s32.totalorder %s506_s7, %s382_s19  ;;  %p386_p6 = scmp.lt.u32.totalorder %s382_s19, %s506_s7 }
 0x36d   :  { %p388_p7 = pnand %p386_p6, %p383_p5 }
 0x36f   :  { %391 = shalt.err (!%p388_p7)
}
 0x370   :  { %311 = dma.vmem_to_hbm [thread:$0]  %s309_s16, 128, %s506_s7, [#allocation3]  }
 0x371   :  { %392 = dma.done.wait [#allocation3], 128  }
 0x372   :  { %393 = vsyncadd [#allocation3], 4294967168 }
 0x373   :  { %315 = vsyncpa [#allocation3], 1 }

</bundles_post_ra>
